<compile_context>
chip_gen: v6e
topology: v6e:2x2x1
jax: 0.10.0
libtpu: 0.0.40
codegen_flags: <defaults>
</compile_context>

<pallas_src>
import functools
import math

import jax
import jax.numpy as jnp
from jax import lax
from jax.experimental import pallas as pl
from jax.experimental.pallas import tpu as pltpu

_EPS = 1e-12  # F.normalize default eps (clamp applied to the norm)


def _round_up(v, m):
    return ((v + m - 1) // m) * m


def _cosine_linear_kernel(x_ref, w_ref, inv_x_ref, inv_w_ref, sigma_ref, *out_refs,
                          training):
    """Grid = (B/TM, C/TN, D/TK); K (reduction) axis last.

    x_ref:     [TM, TK] bf16 input tile   (D on lanes)
    w_ref:     [TK, TN] bf16 weight tile  (pre-transposed; C on lanes)
    inv_x_ref: [TM, 1]  f32 per-row 1/||x||   (precomputed in wrapper)
    inv_w_ref: [1, TN]  f32 per-class 1/||W|| (precomputed once at weight prep)
    sigma_ref: (1,) f32 scalar in SMEM
    outputs:   out_s [TM, TN] f32 (+ out [TM, TN] f32 when training)

    The raw dot product accumulates directly into the resident output block;
    the deferred L2 rescale + sigma happens in place at the last K step.
    """
    if training:
        out_s_ref, out_ref = out_refs
        acc_ref = out_ref          # accumulate into the unscaled output
    else:
        (out_s_ref,) = out_refs
        out_ref = None
        acc_ref = out_s_ref        # accumulate into the (only) output

    k = pl.program_id(2)

    @pl.when(k == 0)
    def _init():
        acc_ref[...] = jnp.zeros_like(acc_ref)

    # Raw (un-normalized) dot product on the MXU, f32 accumulation.
    acc_ref[...] += jnp.dot(x_ref[...], w_ref[...],
                            preferred_element_type=jnp.float32)

    @pl.when(k == pl.num_programs(2) - 1)
    def _finalize():
        scale = inv_x_ref[...] * inv_w_ref[...]      # [TM,1]*[1,TN] -> [TM,TN]
        out = acc_ref[...] * scale
        sigma = sigma_ref[0]
        if training:
            out_ref[...] = out
            out_s_ref[...] = sigma * out
        else:
            out_s_ref[...] = sigma * out


def prepare_cosine_weight(weight, *, tn=512, tk=1024):
    """One-time weight preparation (do this OUTSIDE the training step).

    Pads / transposes the static weight to [Dp, Cp] bf16 and precomputes the
    per-class inverse L2 norms in f32, so nothing weight-related is recomputed
    or re-padded per forward call.
    """
    C, D = weight.shape
    w32 = weight.astype(jnp.float32)

    TN = min(tn, _round_up(C, 128))
    TK = min(tk, _round_up(D, 128))
    Cp = _round_up(C, TN)
    Dp = _round_up(D, TK)

    # Per-class 1/||W_c|| from the original f32 weight (eps^2 clamp == F.normalize
    # eps clamp on the norm). Padded classes get 0 -> exact-zero output columns.
    inv_w = lax.rsqrt(jnp.maximum(jnp.sum(w32 * w32, axis=1), _EPS * _EPS))   # [C]
    inv_w = jnp.pad(inv_w, (0, Cp - C)).reshape(1, Cp)                        # [1, Cp]

    w_t = jnp.pad(w32, ((0, Cp - C), (0, Dp - D))).T.astype(jnp.bfloat16)     # [Dp, Cp]

    return {"w": w_t, "inv_w": inv_w, "C": C, "D": D,
            "Cp": Cp, "Dp": Dp, "TN": TN, "TK": TK}


def cosine_linear(x, weight, sigma, *, training=False,
                  tm=256, tn=512, tk=1024, prepared=None):
    """Pallas CosineLinear forward.

    x:      [B, in_features]
    weight: [out_features, in_features]  (ignored if `prepared` is given)
    sigma:  python/JAX scalar or None
    prepared: optional output of prepare_cosine_weight (reuse across steps).
    """
    B, D = x.shape
    if prepared is None:
        prepared = prepare_cosine_weight(weight, tn=tn, tk=tk)
    assert D == prepared["D"], "in_features mismatch"

    C, Cp, Dp = prepared["C"], prepared["Cp"], prepared["Dp"]
    TN, TK = prepared["TN"], prepared["TK"]

    has_sigma = sigma is not None
    sigma_arr = jnp.asarray([sigma if has_sigma else 1.0], dtype=jnp.float32)

    # Batch tiling: sublane axis multiple of 16 (bf16 packing friendly).
    TM = min(tm, _round_up(B, 16))
    Bp = _round_up(B, TM)

    x32 = x.astype(jnp.float32)
    # Per-row 1/||x|| in f32 (cheap [B,1] reduction; padded rows get 0 -> zeros).
    inv_x = lax.rsqrt(jnp.maximum(jnp.sum(x32 * x32, axis=1, keepdims=True),
                                  _EPS * _EPS))                               # [B, 1]
    inv_x = jnp.pad(inv_x, ((0, Bp - B), (0, 0)))                             # [Bp, 1]

    x_bf = x32.astype(jnp.bfloat16)
    if (Bp, Dp) != (B, D):
        x_bf = jnp.pad(x_bf, ((0, Bp - B), (0, Dp - D)))

    grid = (Bp // TM, Cp // TN, Dp // TK)

    out_block = pl.BlockSpec((TM, TN), lambda i, j, k: (i, j))
    if training:
        out_shape = (jax.ShapeDtypeStruct((Bp, Cp), jnp.float32),   # wsigma
                     jax.ShapeDtypeStruct((Bp, Cp), jnp.float32))   # wosigma
        out_specs = (out_block, pl.BlockSpec((TM, TN), lambda i, j, k: (i, j)))
    else:
        out_shape = jax.ShapeDtypeStruct((Bp, Cp), jnp.float32)
        out_specs = out_block

    kernel = functools.partial(_cosine_linear_kernel, training=bool(training))

    result = pl.pallas_call(
        kernel,
        out_shape=out_shape,
        grid_spec=pltpu.PrefetchScalarGridSpec(
            num_scalar_prefetch=0,
            grid=grid,
            in_specs=[
                pl.BlockSpec((TM, TK), lambda i, j, k: (i, k)),      # x tile (bf16)
                pl.BlockSpec((TK, TN), lambda i, j, k: (k, j)),      # W^T tile (bf16)
                pl.BlockSpec((TM, 1), lambda i, j, k: (i, 0)),       # 1/||x|| rows
                pl.BlockSpec((1, TN), lambda i, j, k: (0, j)),       # 1/||W|| cols
                pl.BlockSpec(memory_space=pltpu.MemorySpace.SMEM),   # sigma scalar
            ],
            out_specs=out_specs,
        ),
        compiler_params=pltpu.CompilerParams(
            dimension_semantics=("parallel", "parallel", "arbitrary"),
            vmem_limit_bytes=48 * 1024 * 1024,
        ),
    )(x_bf, prepared["w"], inv_x, prepared["inv_w"], sigma_arr)

    if training:
        out_s = result[0][:B, :C]
        out = result[1][:B, :C]
        if not has_sigma:
            out_s = out
        return {"wsigma": out_s, "wosigma": out}
    return result[:B, :C]


def init_cosine_linear_params(key, in_features, out_features, sigma=True):
    """Deterministic init matching CosineLinear.reset_parameters()."""
    stdv = 1.0 / math.sqrt(in_features)
    w = jax.random.uniform(
        key, (out_features, in_features), dtype=jnp.float32, minval=-stdv, maxval=stdv
    )
    s = jnp.float32(1.0) if sigma else None
    return w, s


def _reference(x, weight, sigma):
    xn = x / jnp.maximum(jnp.linalg.norm(x, axis=1, keepdims=True), _EPS)
    wn = weight / jnp.maximum(jnp.linalg.norm(weight, axis=1, keepdims=True), _EPS)
    out = xn @ wn.T
    return (sigma if sigma is not None else 1.0) * out


if __name__ == "__main__":
    # Small shapes consistent with the module: x [batch, in_features].
    in_features, out_features, batch = 32, 16, 8

    key = jax.random.PRNGKey(0)
    k_w, k_x, k_w2, k_x2 = jax.random.split(key, 4)

    weight, sigma = init_cosine_linear_params(k_w, in_features, out_features, sigma=True)
    x = jax.random.normal(k_x, (batch, in_features), dtype=jnp.float32)

    # One-time weight preparation (pad + transpose + class norms), reused below.
    prepared = prepare_cosine_weight(weight)

    # eval-mode forward (single sigma-scaled output written by the kernel).
    out_s = cosine_linear(x, weight, sigma, training=False, prepared=prepared)
    out_s = jax.block_until_ready(out_s)

    # training-mode forward (kernel writes both tensors).
    outs = cosine_linear(x, weight, sigma, training=True, prepared=prepared)
    jax.block_until_ready(outs["wsigma"])
    jax.block_until_ready(outs["wosigma"])

    ref = _reference(x, weight, sigma)
    assert out_s.shape == (batch, out_features)
    # bf16 MXU operands -> loosened tolerance vs. the f32 reference.
    assert jnp.allclose(out_s, ref, atol=3e-2, rtol=3e-2)
    assert jnp.allclose(outs["wsigma"], ref, atol=3e-2, rtol=3e-2)
    assert jnp.allclose(outs["wosigma"] * sigma, outs["wsigma"], atol=1e-6)
    assert jnp.allclose(out_s, outs["wsigma"], atol=1e-6)

    # Second check: unaligned shapes + multi-tile grid with a real K reduction
    # (D padded and split into several K tiles; C padded to 128/TN and sliced back).
    B2, D2, C2 = 16, 640, 192
    w2, s2 = init_cosine_linear_params(k_w2, D2, C2, sigma=True)
    x2 = jax.random.normal(k_x2, (B2, D2), dtype=jnp.float32)
    out2 = jax.block_until_ready(cosine_linear(x2, w2, s2, training=False, tk=256))
    ref2 = _reference(x2, w2, s2)
    assert out2.shape == (B2, C2)
    assert jnp.allclose(out2, ref2, atol=3e-2, rtol=3e-2)

    print("KERNEL_OK")
</pallas_src>

<mosaic_0001>
module attributes {stable_mosaic.version = 11 : i64} {
  func.func @_cosine_linear_kernel(%arg0: i32, %arg1: i32, %arg2: i32, %arg3: memref<16x128xbf16, #tpu.memory_space<vmem>>, %arg4: memref<128x128xbf16, #tpu.memory_space<vmem>>, %arg5: memref<16x1xf32, #tpu.memory_space<vmem>>, %arg6: memref<1x128xf32, #tpu.memory_space<vmem>>, %arg7: memref<1xf32, #tpu.memory_space<smem>>, %arg8: memref<16x128xf32, #tpu.memory_space<vmem>>) attributes {dimension_semantics = [#tpu.dimension_semantics<parallel>, #tpu.dimension_semantics<parallel>, #tpu.dimension_semantics<arbitrary>], iteration_bounds = array<i64: 1, 1, 1>, scalar_prefetch = 0 : i64, scratch_operands = 0 : i64, tpu.core_type = #tpu.core_type<tc>, window_params = [{transform_indices = @transform_0, window_bounds = array<i64: 16, 128>}, {transform_indices = @transform_1, window_bounds = array<i64: 128, 128>}, {transform_indices = @transform_2, window_bounds = array<i64: 16, 1>}, {transform_indices = @transform_3, window_bounds = array<i64: 1, 128>}, {transform_indices = @transform_4, window_bounds = array<i64: 1>}, {transform_indices = @transform_5, window_bounds = array<i64: 16, 128>}]} {
    %c0_i32 = arith.constant 0 : i32
    %0 = arith.cmpi eq, %arg2, %c0_i32 : i32
    %1 = arith.extui %0 : i1 to i32
    %c0_i32_0 = arith.constant 0 : i32
    %2 = arith.cmpi ne, %1, %c0_i32_0 : i32
    scf.if %2 {
      %cst_10 = arith.constant 0.000000e+00 : f32
      %12 = vector.broadcast %cst_10 : f32 to vector<16x128xf32>
      %c0_11 = arith.constant 0 : index
      %c0_12 = arith.constant 0 : index
      %13 = vector.load %arg8[%c0_11, %c0_12] : memref<16x128xf32, #tpu.memory_space<vmem>>, vector<16x128xf32>
      tpu.vector_store %arg8[%c0_11, %c0_12], %12 {strides = array<i32>} : memref<16x128xf32, #tpu.memory_space<vmem>>, vector<16x128xf32>,
    } else {
    }
    %c0 = arith.constant 0 : index
    %c0_1 = arith.constant 0 : index
    %3 = vector.load %arg8[%c0, %c0_1] : memref<16x128xf32, #tpu.memory_space<vmem>>, vector<16x128xf32>
    %c0_2 = arith.constant 0 : index
    %c0_3 = arith.constant 0 : index
    %4 = vector.load %arg3[%c0_2, %c0_3] : memref<16x128xbf16, #tpu.memory_space<vmem>>, vector<16x128xbf16>
    %c0_4 = arith.constant 0 : index
    %c0_5 = arith.constant 0 : index
    %5 = vector.load %arg4[%c0_4, %c0_5] : memref<128x128xbf16, #tpu.memory_space<vmem>>, vector<128x128xbf16>
    %cst = arith.constant dense<0.000000e+00> : vector<16x128xf32>
    %6 = tpu.matmul %4, %5, %cst {dimension_numbers = #tpu.dot_dimension_numbers<[1], [0], [0], [1], [0, 0, 1, 1], [], []>} : vector<16x128xbf16>, vector<128x128xbf16>, vector<16x128xf32> -> vector<16x128xf32>
    %7 = arith.addf %3, %6 : vector<16x128xf32>
    %c0_6 = arith.constant 0 : index
    %c0_7 = arith.constant 0 : index
    %8 = vector.load %arg8[%c0_6, %c0_7] : memref<16x128xf32, #tpu.memory_space<vmem>>, vector<16x128xf32>
    tpu.vector_store %arg8[%c0_6, %c0_7], %7 {strides = array<i32>} : memref<16x128xf32, #tpu.memory_space<vmem>>, vector<16x128xf32>,
    %c0_i32_8 = arith.constant 0 : i32
    %9 = arith.cmpi eq, %arg2, %c0_i32_8 : i32
    %10 = arith.extui %9 : i1 to i32
    %c0_i32_9 = arith.constant 0 : i32
    %11 = arith.cmpi ne, %10, %c0_i32_9 : i32
    scf.if %11 {
      %c0_10 = arith.constant 0 : index
      %c0_11 = arith.constant 0 : index
      %12 = vector.load %arg5[%c0_10, %c0_11] : memref<16x1xf32, #tpu.memory_space<vmem>>, vector<16x1xf32>
      %c0_12 = arith.constant 0 : index
      %c0_13 = arith.constant 0 : index
      %13 = vector.load %arg6[%c0_12, %c0_13] : memref<1x128xf32, #tpu.memory_space<vmem>>, vector<1x128xf32>
      %14 = vector.broadcast %12 : vector<16x1xf32> to vector<16x128xf32>
      %15 = vector.broadcast %13 : vector<1x128xf32> to vector<16x128xf32>
      %16 = arith.mulf %14, %15 : vector<16x128xf32>
      %c0_14 = arith.constant 0 : index
      %c0_15 = arith.constant 0 : index
      %17 = vector.load %arg8[%c0_14, %c0_15] : memref<16x128xf32, #tpu.memory_space<vmem>>, vector<16x128xf32>
      %18 = arith.mulf %17, %16 : vector<16x128xf32>
      %c0_16 = arith.constant 0 : index
      %19 = memref.load %arg7[%c0_16] : memref<1xf32, #tpu.memory_space<smem>>
      %20 = vector.broadcast %19 : f32 to vector<16x128xf32>
      %21 = arith.mulf %20, %18 : vector<16x128xf32>
      %c0_17 = arith.constant 0 : index
      %c0_18 = arith.constant 0 : index
      %22 = vector.load %arg8[%c0_17, %c0_18] : memref<16x128xf32, #tpu.memory_space<vmem>>, vector<16x128xf32>
      tpu.vector_store %arg8[%c0_17, %c0_18], %21 {strides = array<i32>} : memref<16x128xf32, #tpu.memory_space<vmem>>, vector<16x128xf32>,
    } else {
    }
    return
  }
  func.func @transform_0(%arg0: i32, %arg1: i32, %arg2: i32) -> (i32, i32) {
    %c0_i32 = arith.constant 0 : i32
    return %arg0, %arg2 : i32, i32
  }
  func.func @transform_1(%arg0: i32, %arg1: i32, %arg2: i32) -> (i32, i32) {
    %c0_i32 = arith.constant 0 : i32
    return %arg2, %arg1 : i32, i32
  }
  func.func @transform_2(%arg0: i32, %arg1: i32, %arg2: i32) -> (i32, i32) {
    %c0_i32 = arith.constant 0 : i32
    %c0_i32_0 = arith.constant 0 : i32
    return %arg0, %c0_i32 : i32, i32
  }
  func.func @transform_3(%arg0: i32, %arg1: i32, %arg2: i32) -> (i32, i32) {
    %c0_i32 = arith.constant 0 : i32
    %c0_i32_0 = arith.constant 0 : i32
    return %c0_i32, %arg1 : i32, i32
  }
  func.func @transform_4(%arg0: i32, %arg1: i32, %arg2: i32) -> i32 {
    %c0_i32 = arith.constant 0 : i32
    %c0_i32_0 = arith.constant 0 : i32
    return %c0_i32 : i32
  }
  func.func @transform_5(%arg0: i32, %arg1: i32, %arg2: i32) -> (i32, i32) {
    %c0_i32 = arith.constant 0 : i32
    return %arg0, %arg1 : i32, i32
  }
}

</mosaic_0001>

<bundles_post_ra>
// kernel: tpu_custom_call.1
= control target key start
LH: loop header
LB: loop body
LE: loop exit
PB: predicated region body
PF: predicated region fallthrough
CT: control target
= control target key end

     0   :  { %11 = vsyncpa [#allocation4], 0  ;;  %s375_s0 = inlined_call_operand.vmem [shape: bf16[16,128], index: 0, kind: input, shape index: {}]   ;;  %s376_s1 = inlined_call_operand.hbm [shape: bf16[128,128], index: 1, kind: input, shape index: {}]   ;;  %s377_s2 = inlined_call_operand.vmem [shape: f32[16,1], index: 2, kind: input, shape index: {}]   ;;  %s378_s3 = inlined_call_operand.vmem [shape: f32[1,128], index: 3, kind: input, shape index: {}]   ;;  %s379_s4 = inlined_call_operand.<no memory space> [shape: f32[1], index: 4, kind: input, shape index: {}]   ;;  %s380_s5 = inlined_call_operand.hbm [shape: f32[16,128], index: 5, kind: output, shape index: {}]  }
   0x1   :  { %12 = vsyncpa [#allocation5], 0  ;;  %s315_s18 = smov [#allocation3]  }
   0x2   :  { %s20_s19 = sshll.u32 %s315_s18, 4  ;;  %s21_s19 = int_to_ptr.vmem [resolvable:$true] %s20_s19 }
   0x3   :  { %s279_s20 = scalar_lea.vmem %s21_s19, 1024  ;;  %p284_p1 = scmp.lt.s32.totalorder %s21_s19, %s21_s19 }
   0x4   :  { %p280_p0 = scmp.ne.s32.totalorder %s21_s19, %s279_s20  ;;  %p285_p2 = scmp.lt.s32.totalorder %s279_s20, %s279_s20 }
   0x6   :  { %p286_p3 = por %p285_p2, %p284_p1 }
   0x8   :  { %p287_p4 = pnand %p286_p3, %p280_p0 }
   0xa   :  { %290 = shalt.err (!%p287_p4)
}
   0xb   :  { %s316_s21 = smov 64   ;;  %s317_s22 = smov 4  }
   0xc   :  { %26 = dma.hbm_to_vmem [thread:$0]  %s376_s1, 1024, %s21_s19, [#allocation4], %s316_s21, %s316_s21, %s317_s22  }
   0xd   :  { %311 = dma.done.wait [#allocation4], 1024  }
   0xe   :  { %312 = vsyncadd [#allocation4], 4294966272  ;;  %v318_v0 = vmov 0.0   ;;  %vm319_vm0 = vmmov 0   ;;  %v320_v1 = vmov 0   ;;  %v262_v2 = vld [vmem:[#allocation3 + $0x38] sm:$0xff]   ;;  %v191_v18 = vstv %s379_s4 }
   0xf   :  { %232 = vmatprep.subr.bf16.mxu0 %v318_v0  ;;  %248 = vmatprep.mubr.msk.bf16.mxu0 %vm319_vm0, %v318_v0  ;;  %v263_v3 = vld [vmem:[#allocation3 + $0x30] sm:$0xff]   ;;  %v264_v4 = vld [vmem:[#allocation3 + $0x28] sm:$0xff]   ;;  %v165_v5 = vld [vmem:[%s377_s2] sm:$0xff] }
  0x10   :  { %261 = vset.pattern.permute.xlu0 %v320_v1  ;;  %233 = vmatpush3.bf16.msra.mxu0 %v262_v2  ;;  %v265_v6 = vld [vmem:[#allocation3 + $0x20] sm:$0xff]   ;;  %v166_v7 = vld [vmem:[%s377_s2 + $0x8] sm:$0xff]  ;;  %v266_v8 = vld [vmem:[#allocation3 + $0x18] sm:$0xff]  }
  0x11   :  { %234 = vmatprep.subr.bf16.mxu0 %v318_v0  ;;  %170 = vperm.xlu0 %261, %v165_v5   ;;  %v267_v9 = vld [vmem:[#allocation3 + $0x10] sm:$0xff]   ;;  %v268_v10 = vld [vmem:[#allocation3 + $0x8] sm:$0xff]   ;;  %v269_v11 = vld [vmem:[#allocation3] sm:$0xff]  }
  0x12   :  { %v270_v12 = vld [vmem:[%s375_s0] sm:$0xff]   ;;  %s321_s0 = smov [#allocation6]  }
  0x13   :  { %v222_v13 = vld [vmem:[%s378_s3] ss:$0 sm:$0xff]  ;;  %s201_s8 = sshll.u32 %s321_s0, 4  ;;  %s202_s8 = int_to_ptr.vmem [resolvable:$true] %s201_s8 }
  0x14   :  { %235 = vmatpush3.bf16.msra.mxu0 %v263_v3  ;;  %s291_s3 = scalar_lea.vmem %s202_s8, 256  ;;  %p296_p6 = scmp.lt.s32.totalorder %s202_s8, %s202_s8 }
  0x15   :  { %236 = vmatprep.subr.bf16.mxu0 %v318_v0  ;;  %175 = vperm.xlu0 %261, %v166_v7   ;;  %p292_p5 = scmp.ne.s32.totalorder %s202_s8, %s291_s3  ;;  %p297_p7 = scmp.lt.s32.totalorder %s291_s3, %s291_s3 }
  0x17   :  { %p298_p8 = por %p297_p7, %p296_p6 }
  0x18   :  { %237 = vmatpush3.bf16.msra.mxu0 %v264_v4 }
  0x19   :  { %238 = vmatprep.subr.bf16.mxu0 %v318_v0  ;;  %p299_p9 = pnand %p298_p8, %p292_p5 }
  0x1c   :  { %239 = vmatpush3.bf16.msra.mxu0 %v265_v6 }
  0x1d   :  { %240 = vmatprep.subr.bf16.mxu0 %v318_v0 }
  0x20   :  { %241 = vmatpush3.bf16.msra.mxu0 %v266_v8 }
  0x21   :  { %242 = vmatprep.subr.bf16.mxu0 %v318_v0 }
  0x24   :  { %243 = vmatpush3.bf16.msra.mxu0 %v267_v9 }
  0x25   :  { %244 = vmatprep.subr.bf16.mxu0 %v318_v0 }
  0x28   :  { %245 = vmatpush3.bf16.msra.mxu0 %v268_v10 }
  0x29   :  { %246 = vmatprep.subr.bf16.mxu0 %v318_v0 }
  0x2c   :  { %247 = vmatpush3.bf16.msra.mxu0 %v269_v11 }
  0x2f   :  { %249 = vmatmul.mubr.bf16.vlgmr.msra.gmra.mxu0 %v270_v12 }
  0x8c   :  { %v171_v14 = vpop.permute.xlu0 %170 }
  0x8d   :  { %v184_v15 = vmul.f32 %v222_v13, %v171_v14 }
  0x90   :  { %v176_v19 = vpop.permute.xlu0 %175 }
  0x91   :  { %v185_v23 = vmul.f32 %v222_v13, %v176_v19 }
  0xef   :  { %v151_v16 = vpop.f32.mrf.mxu0 }
  0xf0   :  { %v188_v20 = vmul.f32 %v184_v15, %v151_v16 }
  0xf1   :  { %v250_v17 = vpop.f32.mrf.mxu0 }
  0xf2   :  { %v192_v22 = vmul.f32 %v191_v18, %v188_v20 }
  0xf3   :  { %v154_v21 = vpop.f32.mrf.mxu0 }
  0xf4   :  { %194 = vst [vmem:[#allocation6] sm:$0xff] %v192_v22  ;;  %v189_v25 = vmul.f32 %v185_v23, %v154_v21 }
  0xf5   :  { %v251_v24 = vpop.f32.mrf.mxu0 }
  0xf6   :  { %v193_v26 = vmul.f32 %v191_v18, %v189_v25 }
  0xf8   :  { %195 = vst [vmem:[#allocation6 + $0x8] sm:$0xff] %v193_v26 }
  0xf9   :  { %302 = shalt.err (!%p299_p9)
}
  0xfa   :  { %s322_s4 = smov 128   ;;  %s323_s9 = smov 8  }
  0xfb   :  { %207 = dma.vmem_to_hbm [thread:$0]  %s202_s8, 256, %s380_s5, [#allocation5], %s322_s4, %s322_s4, %s323_s9  }
  0xfc   :  { %313 = dma.done.wait [#allocation5], 256  }
  0xfd   :  { %314 = vsyncadd [#allocation5], 4294967040 }
  0xfe   :  { %211 = vsyncpa [#allocation4], 1 }
  0xff   :  { %212 = vsyncpa [#allocation5], 1 }

</bundles_post_ra>
